<compile_context>
chip_gen: v5e
topology: v5e:2x2
jax: 0.10.0
libtpu: 0.0.40
codegen_flags: <defaults>
</compile_context>

<pallas_src>
import math

import jax
import jax.numpy as jnp
import numpy as np
from jax.experimental import pallas as pl
from jax.experimental.pallas import tpu as pltpu


_WCHUNK = 512  # column slab for the in-kernel K-chunked one-hot matmul


def _equi2cube_kernel(src_ref, tab_ref, out_ref):
    """One (face, row-band) grid step: separable bilinear resample.

    src_ref: (H, W)        bf16, resident equirect map (single-buffered).
    tab_ref: (1, 1, 8, tn) f32, rows = [x0, x1, y0, y1, 1-wx, wx, 1-wy, wy].
    out_ref: (1, 1, tr, F) f32, band of `tr` face rows.
    """
    H, W = src_ref.shape
    tr, Fc = out_ref.shape[2], out_ref.shape[3]
    tn = tr * Fc

    tab = tab_ref[0, 0]                                     # (8, tn) f32
    xt = jnp.concatenate([tab[0:1, :], tab[1:2, :]], axis=-1).astype(jnp.int32)
    y0 = tab[2:3, :].astype(jnp.int32)                      # (1, tn)
    y1 = tab[3:4, :].astype(jnp.int32)
    wx0, wx1 = tab[4:5, :], tab[5:6, :]
    wy0, wy1 = tab[6:7, :], tab[7:8, :]

    def col_blend(src_block, col0):
        # Binary one-hot (exact in bf16): column j contributes to output pixel
        # p iff j == x0[p] (left half of the lanes) or j == x1[p] (right half).
        width = src_block.shape[1]
        cols = jax.lax.broadcasted_iota(jnp.int32, (width, 2 * tn), 0) + col0
        onehot = (cols == xt).astype(jnp.bfloat16)          # (width, 2*tn)
        return jnp.dot(src_block, onehot,
                       preferred_element_type=jnp.float32)  # (H, 2*tn) f32

    # K-chunk the column blend so the (W, 2*tn) intermediates stay bounded.
    wchunk = W if (W <= _WCHUNK or W % _WCHUNK != 0) else _WCHUNK
    nchunks = W // wchunk
    if nchunks == 1:
        g = col_blend(src_ref[...], 0)
    else:
        def body(c, acc):
            col0 = pl.multiple_of(c * wchunk, wchunk)
            return acc + col_blend(src_ref[:, pl.ds(col0, wchunk)], col0)
        g = jax.lax.fori_loop(0, nchunks, body,
                              jnp.zeros((H, 2 * tn), jnp.float32), unroll=True)

    # Horizontal taps blended with exact f32 weights on the VPU.
    hcol = g[:, :tn] * wx0 + g[:, tn:] * wx1                # (H, tn)

    # Vertical taps: weighted one-hot rows, reduce over sublanes.
    rows = jax.lax.broadcasted_iota(jnp.int32, (H, tn), 0)
    oy = jnp.where(rows == y0, wy0, 0.0) + jnp.where(rows == y1, wy1, 0.0)
    flat = jnp.sum(oy * hcol, axis=0, keepdims=True)        # (1, tn)

    # Store one face row at a time (avoids an in-kernel (1,tn)->(tr,F) relayout
    # reshape; the HBM writeback is still one dense (tr, F) block).
    for i in range(tr):
        out_ref[0, 0, pl.ds(i, 1), :] = flat[:, i * Fc:(i + 1) * Fc]


def _pick_row_band(F, H):
    """Face rows per grid step; the output tile is (tr, F) pixels.

    Bounds the f32 intermediates (g: (H, 2*tn), hcol/oy: (H, tn)) to ~12 MiB so
    the kernel fits comfortably inside v7x's 64 MiB VMEM; small faces get the
    whole face per step (sublane-dense stores, minimal grid trip count).
    """
    budget_pixels = (12 << 20) // max(1, 12 * H)
    budget_pixels = max(min(budget_pixels, 4096), F)   # at least one face row
    tr = 1
    for cand in range(1, F + 1):
        if F % cand == 0 and cand * F <= budget_pixels:
            tr = cand
    return tr


def _vmem_limit_bytes(H, W, tn):
    """Scoped-VMEM limit computed from the actual per-step footprint."""
    wchunk = W if (W <= _WCHUNK or W % _WCHUNK != 0) else _WCHUNK
    footprint = (
        2 * H * W * 2            # bf16 source (x2 in case single-buffer hint is unavailable)
        + 2 * 8 * tn * 4         # packed table block, double-buffered
        + 2 * tn * 4             # output block, double-buffered
        + H * 2 * tn * 4         # g (column-blend result, f32)
        + 2 * H * tn * 4         # hcol + oy (f32)
        + wchunk * 2 * tn * 6    # one-hot (bf16) + column iota (i32) slab
        + (8 << 20)              # headroom for spills / pipeline bookkeeping
    )
    return int(min(max(footprint, 32 << 20), 100 << 20))


def _cube_sampling_params(H, W, F, fov_deg):
    """Packed per-face sampling table, shape (6, 8, F, F) float32.

    Rows: [x0, x1, y0, y1, 1-wx, wx, 1-wy, wy].  Indices are stored as f32
    (exact for any realistic H, W) so everything travels as one DMA stream.
    Longitude wraps; latitude border-replicates at the poles.
    """
    half = math.tan(math.radians(fov_deg) / 2.0)
    t = ((jnp.arange(F, dtype=jnp.float32) + 0.5) / F * 2.0 - 1.0) * half
    xx, yy = jnp.meshgrid(t, t)              # xx: columns, yy: rows
    ones = jnp.ones_like(xx)

    faces = [
        jnp.stack([xx, -yy, ones], -1),      # front  +z
        jnp.stack([ones, -yy, -xx], -1),     # right  +x
        jnp.stack([-xx, -yy, -ones], -1),    # back   -z
        jnp.stack([-ones, -yy, xx], -1),     # left   -x
        jnp.stack([xx, ones, yy], -1),       # up     +y
        jnp.stack([xx, -ones, -yy], -1),     # down   -y
    ]
    d = jnp.stack(faces, 0)                  # (6, F, F, 3)
    x, y, z = d[..., 0], d[..., 1], d[..., 2]

    lon = jnp.arctan2(x, z)                                  # [-pi, pi]
    lat = jnp.arctan2(y, jnp.sqrt(x * x + z * z))            # [-pi/2, pi/2]

    u = (lon / (2.0 * jnp.pi) + 0.5) * W - 0.5               # equirect col (wrap)
    v = (0.5 - lat / jnp.pi) * H - 0.5                       # equirect row (border)

    x0f = jnp.floor(u)
    y0f = jnp.floor(v)
    wx = u - x0f
    wy = v - y0f

    x0 = jnp.mod(x0f.astype(jnp.int32), W)
    x1 = jnp.mod(x0 + 1, W)
    y0i = y0f.astype(jnp.int32)
    y0 = jnp.clip(y0i, 0, H - 1)
    y1 = jnp.clip(y0i + 1, 0, H - 1)         # independent clip -> border replicate

    tab = jnp.stack([x0.astype(jnp.float32), x1.astype(jnp.float32),
                     y0.astype(jnp.float32), y1.astype(jnp.float32),
                     1.0 - wx, wx, 1.0 - wy, wy], axis=1)    # (6, 8, F, F)
    return tab.astype(jnp.float32)


def disparity_forward(disp, fov=120.0, face_size=None):
    """Pallas equivalent of Disparity.forward(): equirect (1,H,W) -> (6,F,F)."""
    C, H, W = disp.shape
    assert C == 1, "Disparity holds a single-channel map"
    F = face_size if face_size is not None else W // 4

    tr = _pick_row_band(F, H)
    Rb = F // tr
    tn = tr * F

    # Packed sampling table rearranged so each grid step reads one dense
    # (8, tn) block: (6, 8, F, F) -> (6, Rb, 8, tr*F).
    tab = _cube_sampling_params(H, W, F, fov)
    tab = tab.reshape(6, 8, Rb, tn).transpose(0, 2, 1, 3)

    # bf16 source: halves resident VMEM + HBM traffic; MXU accumulates in f32.
    src = disp[0].astype(jnp.bfloat16)

    cost = pl.CostEstimate(
        flops=int(2 * H * W * 2 * F * F * 6),
        transcendentals=0,
        bytes_accessed=int(H * W * 2 + 6 * 8 * F * F * 4 + 6 * F * F * 4),
    )
    vmem_limit = _vmem_limit_bytes(H, W, tn)

    def build(single_buffer_src):
        src_kwargs = {"pipeline_mode": pl.Buffered(1)} if single_buffer_src else {}
        return pl.pallas_call(
            _equi2cube_kernel,
            out_shape=jax.ShapeDtypeStruct((6, Rb, tr, F), jnp.float32),
            grid=(6, Rb),
            in_specs=[
                pl.BlockSpec((H, W), lambda f, r: (0, 0), **src_kwargs),
                pl.BlockSpec((1, 1, 8, tn), lambda f, r: (f, r, 0, 0)),
            ],
            out_specs=pl.BlockSpec((1, 1, tr, F), lambda f, r: (f, r, 0, 0)),
            compiler_params=pltpu.CompilerParams(
                dimension_semantics=("parallel", "parallel"),
                vmem_limit_bytes=vmem_limit,
            ),
            cost_estimate=cost,
        )

    try:
        out = build(single_buffer_src=True)(src, tab)
    except Exception:
        # Fallback if the installed Pallas rejects the single-buffering hint on
        # the constant-index source block; default pipeline is identical in
        # semantics (just 2x src VMEM).
        out = build(single_buffer_src=False)(src, tab)

    return out.reshape(6, F, F)


def _reference_forward(disp, fov, F):
    """Pure-JAX reference (4-tap gather-blend) for correctness checking."""
    C, H, W = disp.shape
    tab = _cube_sampling_params(H, W, F, fov)
    x0 = tab[:, 0].astype(jnp.int32)
    x1 = tab[:, 1].astype(jnp.int32)
    y0 = tab[:, 2].astype(jnp.int32)
    y1 = tab[:, 3].astype(jnp.int32)
    wx0, wx1, wy0, wy1 = tab[:, 4], tab[:, 5], tab[:, 6], tab[:, 7]
    flat = disp.reshape(-1)

    def g(yy, xi):
        return jnp.take(flat, (yy * W + xi).reshape(-1)).reshape(6, F, F)

    return (wy0 * (wx0 * g(y0, x0) + wx1 * g(y0, x1))
            + wy1 * (wx0 * g(y1, x0) + wx1 * g(y1, x1)))


if __name__ == "__main__":
    # Small shapes consistent with the module: disp (1, H, W), fov=120.
    H, W = 16, 32
    fov = 120.0
    face = W // 4   # 8

    key = jax.random.PRNGKey(0)
    # nn.Parameter of shape (1, H, W); deterministic non-trivial init
    # (zeros as in the original __init__ would make the test vacuous).
    disp = jax.random.normal(key, (1, H, W), dtype=jnp.float32)

    cube = jax.block_until_ready(disparity_forward(disp, fov=fov, face_size=face))
    assert cube.shape == (6, face, face)

    # Tight check: reference fed the same bf16-quantized source (kernel math is
    # exact apart from the bf16 source quantization).
    disp_q = disp.astype(jnp.bfloat16).astype(jnp.float32)
    ref_q = jax.block_until_ready(_reference_forward(disp_q, fov, face))
    np.testing.assert_allclose(np.asarray(cube), np.asarray(ref_q),
                               rtol=1e-4, atol=1e-5)

    # Loose check against the full-f32 reference (bf16 source quantization only).
    ref = jax.block_until_ready(_reference_forward(disp, fov, face))
    np.testing.assert_allclose(np.asarray(cube), np.asarray(ref),
                               rtol=2e-2, atol=2e-2)

    print("KERNEL_OK")
</pallas_src>

<mosaic_0001>
module attributes {stable_mosaic.version = 11 : i64} {
  func.func @_equi2cube_kernel(%arg0: i32, %arg1: i32, %arg2: memref<16x32xbf16, #tpu.memory_space<vmem>>, %arg3: memref<1x1x8x64xf32, #tpu.memory_space<vmem>>, %arg4: memref<1x1x8x8xf32, #tpu.memory_space<vmem>>) attributes {dimension_semantics = [#tpu.dimension_semantics<parallel>, #tpu.dimension_semantics<parallel>], iteration_bounds = array<i64: 6, 1>, scalar_prefetch = 0 : i64, scratch_operands = 0 : i64, tpu.core_type = #tpu.core_type<tc>, window_params = [{pipeline_mode = #tpu.pipeline_mode<synchronous>, transform_indices = @transform_0, window_bounds = array<i64: 16, 32>}, {transform_indices = @transform_1, window_bounds = array<i64: 1, 1, 8, 64>}, {transform_indices = @transform_2, window_bounds = array<i64: 1, 1, 8, 8>}]} {
    %c0 = arith.constant 0 : index
    %c0_0 = arith.constant 0 : index
    %c0_1 = arith.constant 0 : index
    %c0_2 = arith.constant 0 : index
    %0 = vector.load %arg3[%c0, %c0_0, %c0_1, %c0_2] : memref<1x1x8x64xf32, #tpu.memory_space<vmem>>, vector<1x1x8x64xf32>
    %1 = vector.shape_cast %0 : vector<1x1x8x64xf32> to vector<8x64xf32>
    %2 = vector.extract_strided_slice %1 {offsets = [0, 0], sizes = [1, 64], strides = [1, 1]} : vector<8x64xf32> to vector<1x64xf32>
    %3 = vector.extract_strided_slice %1 {offsets = [1, 0], sizes = [1, 64], strides = [1, 1]} : vector<8x64xf32> to vector<1x64xf32>
    %4 = tpu.concatenate %2, %3 in 1 : vector<1x64xf32>, vector<1x64xf32> -> vector<1x128xf32>
    %5 = arith.fptosi %4 : vector<1x128xf32> to vector<1x128xi32>
    %6 = vector.extract_strided_slice %1 {offsets = [2, 0], sizes = [1, 64], strides = [1, 1]} : vector<8x64xf32> to vector<1x64xf32>
    %7 = arith.fptosi %6 : vector<1x64xf32> to vector<1x64xi32>
    %8 = vector.extract_strided_slice %1 {offsets = [3, 0], sizes = [1, 64], strides = [1, 1]} : vector<8x64xf32> to vector<1x64xf32>
    %9 = arith.fptosi %8 : vector<1x64xf32> to vector<1x64xi32>
    %10 = vector.extract_strided_slice %1 {offsets = [4, 0], sizes = [1, 64], strides = [1, 1]} : vector<8x64xf32> to vector<1x64xf32>
    %11 = vector.extract_strided_slice %1 {offsets = [5, 0], sizes = [1, 64], strides = [1, 1]} : vector<8x64xf32> to vector<1x64xf32>
    %12 = vector.extract_strided_slice %1 {offsets = [6, 0], sizes = [1, 64], strides = [1, 1]} : vector<8x64xf32> to vector<1x64xf32>
    %13 = vector.extract_strided_slice %1 {offsets = [7, 0], sizes = [1, 64], strides = [1, 1]} : vector<8x64xf32> to vector<1x64xf32>
    %c0_3 = arith.constant 0 : index
    %c0_4 = arith.constant 0 : index
    %14 = vector.load %arg2[%c0_3, %c0_4] : memref<16x32xbf16, #tpu.memory_space<vmem>>, vector<16x32xbf16>
    %15 = tpu.iota {dimensions = array<i32: 0>} : vector<32x128xi32>
    %c0_i32 = arith.constant 0 : i32
    %16 = vector.broadcast %c0_i32 : i32 to vector<32x128xi32>
    %17 = arith.addi %15, %16 : vector<32x128xi32>
    %18 = vector.broadcast %5 : vector<1x128xi32> to vector<32x128xi32>
    %19 = arith.cmpi eq, %17, %18 : vector<32x128xi32>
    %20 = arith.extui %19 : vector<32x128xi1> to vector<32x128xi32>
    %21 = arith.sitofp %20 : vector<32x128xi32> to vector<32x128xf32>
    %22 = arith.truncf %21 : vector<32x128xf32> to vector<32x128xbf16>
    %cst = arith.constant dense<0.000000e+00> : vector<16x128xf32>
    %23 = tpu.matmul %14, %22, %cst {dimension_numbers = #tpu.dot_dimension_numbers<[1], [0], [0], [1], [0, 0, 1, 1], [], []>} : vector<16x32xbf16>, vector<32x128xbf16>, vector<16x128xf32> -> vector<16x128xf32>
    %24 = vector.extract_strided_slice %23 {offsets = [0, 0], sizes = [16, 64], strides = [1, 1]} : vector<16x128xf32> to vector<16x64xf32>
    %25 = vector.broadcast %10 : vector<1x64xf32> to vector<16x64xf32>
    %26 = arith.mulf %24, %25 : vector<16x64xf32>
    %27 = vector.extract_strided_slice %23 {offsets = [0, 64], sizes = [16, 64], strides = [1, 1]} : vector<16x128xf32> to vector<16x64xf32>
    %28 = vector.broadcast %11 : vector<1x64xf32> to vector<16x64xf32>
    %29 = arith.mulf %27, %28 : vector<16x64xf32>
    %30 = arith.addf %26, %29 : vector<16x64xf32>
    %31 = tpu.iota {dimensions = array<i32: 0>} : vector<16x64xi32>
    %32 = vector.broadcast %7 : vector<1x64xi32> to vector<16x64xi32>
    %33 = arith.cmpi eq, %31, %32 : vector<16x64xi32>
    %cst_5 = arith.constant 0.000000e+00 : f32
    %34 = vector.shape_cast %12 : vector<1x64xf32> to vector<1x64xf32>
    %35 = vector.broadcast %34 : vector<1x64xf32> to vector<16x64xf32>
    %36 = vector.broadcast %cst_5 : f32 to vector<16x64xf32>
    %37 = arith.select %33, %35, %36 : vector<16x64xi1>, vector<16x64xf32>
    %38 = vector.broadcast %9 : vector<1x64xi32> to vector<16x64xi32>
    %39 = arith.cmpi eq, %31, %38 : vector<16x64xi32>
    %cst_6 = arith.constant 0.000000e+00 : f32
    %40 = vector.shape_cast %13 : vector<1x64xf32> to vector<1x64xf32>
    %41 = vector.broadcast %40 : vector<1x64xf32> to vector<16x64xf32>
    %42 = vector.broadcast %cst_6 : f32 to vector<16x64xf32>
    %43 = arith.select %39, %41, %42 : vector<16x64xi1>, vector<16x64xf32>
    %44 = arith.addf %37, %43 : vector<16x64xf32>
    %45 = arith.mulf %44, %30 : vector<16x64xf32>
    %cst_7 = arith.constant dense<0.000000e+00> : vector<64xf32>
    %46 = vector.multi_reduction <add>, %45, %cst_7 [0] : vector<16x64xf32> to vector<64xf32>
    %47 = vector.shape_cast %46 : vector<64xf32> to vector<1x64xf32>
    %48 = vector.extract_strided_slice %47 {offsets = [0, 0], sizes = [1, 8], strides = [1, 1]} : vector<1x64xf32> to vector<1x8xf32>
    %c0_8 = arith.constant 0 : index
    %c0_9 = arith.constant 0 : index
    %c0_10 = arith.constant 0 : index
    %c0_11 = arith.constant 0 : index
    %49 = vector.load %arg4[%c0_8, %c0_9, %c0_10, %c0_11] : memref<1x1x8x8xf32, #tpu.memory_space<vmem>>, vector<1x1x1x8xf32>
    %50 = vector.shape_cast %49 : vector<1x1x1x8xf32> to vector<1x8xf32>
    %51 = vector.shape_cast %48 : vector<1x8xf32> to vector<1x1x1x8xf32>
    tpu.vector_store %arg4[%c0_8, %c0_9, %c0_10, %c0_11], %51 {strides = array<i32>} : memref<1x1x8x8xf32, #tpu.memory_space<vmem>>, vector<1x1x1x8xf32>,
    %52 = vector.extract_strided_slice %47 {offsets = [0, 8], sizes = [1, 8], strides = [1, 1]} : vector<1x64xf32> to vector<1x8xf32>
    %c0_12 = arith.constant 0 : index
    %c0_13 = arith.constant 0 : index
    %c1 = arith.constant 1 : index
    %c0_14 = arith.constant 0 : index
    %53 = vector.load %arg4[%c0_12, %c0_13, %c1, %c0_14] : memref<1x1x8x8xf32, #tpu.memory_space<vmem>>, vector<1x1x1x8xf32>
    %54 = vector.shape_cast %53 : vector<1x1x1x8xf32> to vector<1x8xf32>
    %55 = vector.shape_cast %52 : vector<1x8xf32> to vector<1x1x1x8xf32>
    tpu.vector_store %arg4[%c0_12, %c0_13, %c1, %c0_14], %55 {strides = array<i32>} : memref<1x1x8x8xf32, #tpu.memory_space<vmem>>, vector<1x1x1x8xf32>,
    %56 = vector.extract_strided_slice %47 {offsets = [0, 16], sizes = [1, 8], strides = [1, 1]} : vector<1x64xf32> to vector<1x8xf32>
    %c0_15 = arith.constant 0 : index
    %c0_16 = arith.constant 0 : index
    %c2 = arith.constant 2 : index
    %c0_17 = arith.constant 0 : index
    %57 = vector.load %arg4[%c0_15, %c0_16, %c2, %c0_17] : memref<1x1x8x8xf32, #tpu.memory_space<vmem>>, vector<1x1x1x8xf32>
    %58 = vector.shape_cast %57 : vector<1x1x1x8xf32> to vector<1x8xf32>
    %59 = vector.shape_cast %56 : vector<1x8xf32> to vector<1x1x1x8xf32>
    tpu.vector_store %arg4[%c0_15, %c0_16, %c2, %c0_17], %59 {strides = array<i32>} : memref<1x1x8x8xf32, #tpu.memory_space<vmem>>, vector<1x1x1x8xf32>,
    %60 = vector.extract_strided_slice %47 {offsets = [0, 24], sizes = [1, 8], strides = [1, 1]} : vector<1x64xf32> to vector<1x8xf32>
    %c0_18 = arith.constant 0 : index
    %c0_19 = arith.constant 0 : index
    %c3 = arith.constant 3 : index
    %c0_20 = arith.constant 0 : index
    %61 = vector.load %arg4[%c0_18, %c0_19, %c3, %c0_20] : memref<1x1x8x8xf32, #tpu.memory_space<vmem>>, vector<1x1x1x8xf32>
    %62 = vector.shape_cast %61 : vector<1x1x1x8xf32> to vector<1x8xf32>
    %63 = vector.shape_cast %60 : vector<1x8xf32> to vector<1x1x1x8xf32>
    tpu.vector_store %arg4[%c0_18, %c0_19, %c3, %c0_20], %63 {strides = array<i32>} : memref<1x1x8x8xf32, #tpu.memory_space<vmem>>, vector<1x1x1x8xf32>,
    %64 = vector.extract_strided_slice %47 {offsets = [0, 32], sizes = [1, 8], strides = [1, 1]} : vector<1x64xf32> to vector<1x8xf32>
    %c0_21 = arith.constant 0 : index
    %c0_22 = arith.constant 0 : index
    %c4 = arith.constant 4 : index
    %c0_23 = arith.constant 0 : index
    %65 = vector.load %arg4[%c0_21, %c0_22, %c4, %c0_23] : memref<1x1x8x8xf32, #tpu.memory_space<vmem>>, vector<1x1x1x8xf32>
    %66 = vector.shape_cast %65 : vector<1x1x1x8xf32> to vector<1x8xf32>
    %67 = vector.shape_cast %64 : vector<1x8xf32> to vector<1x1x1x8xf32>
    tpu.vector_store %arg4[%c0_21, %c0_22, %c4, %c0_23], %67 {strides = array<i32>} : memref<1x1x8x8xf32, #tpu.memory_space<vmem>>, vector<1x1x1x8xf32>,
    %68 = vector.extract_strided_slice %47 {offsets = [0, 40], sizes = [1, 8], strides = [1, 1]} : vector<1x64xf32> to vector<1x8xf32>
    %c0_24 = arith.constant 0 : index
    %c0_25 = arith.constant 0 : index
    %c5 = arith.constant 5 : index
    %c0_26 = arith.constant 0 : index
    %69 = vector.load %arg4[%c0_24, %c0_25, %c5, %c0_26] : memref<1x1x8x8xf32, #tpu.memory_space<vmem>>, vector<1x1x1x8xf32>
    %70 = vector.shape_cast %69 : vector<1x1x1x8xf32> to vector<1x8xf32>
    %71 = vector.shape_cast %68 : vector<1x8xf32> to vector<1x1x1x8xf32>
    tpu.vector_store %arg4[%c0_24, %c0_25, %c5, %c0_26], %71 {strides = array<i32>} : memref<1x1x8x8xf32, #tpu.memory_space<vmem>>, vector<1x1x1x8xf32>,
    %72 = vector.extract_strided_slice %47 {offsets = [0, 48], sizes = [1, 8], strides = [1, 1]} : vector<1x64xf32> to vector<1x8xf32>
    %c0_27 = arith.constant 0 : index
    %c0_28 = arith.constant 0 : index
    %c6 = arith.constant 6 : index
    %c0_29 = arith.constant 0 : index
    %73 = vector.load %arg4[%c0_27, %c0_28, %c6, %c0_29] : memref<1x1x8x8xf32, #tpu.memory_space<vmem>>, vector<1x1x1x8xf32>
    %74 = vector.shape_cast %73 : vector<1x1x1x8xf32> to vector<1x8xf32>
    %75 = vector.shape_cast %72 : vector<1x8xf32> to vector<1x1x1x8xf32>
    tpu.vector_store %arg4[%c0_27, %c0_28, %c6, %c0_29], %75 {strides = array<i32>} : memref<1x1x8x8xf32, #tpu.memory_space<vmem>>, vector<1x1x1x8xf32>,
    %76 = vector.extract_strided_slice %47 {offsets = [0, 56], sizes = [1, 8], strides = [1, 1]} : vector<1x64xf32> to vector<1x8xf32>
    %c0_30 = arith.constant 0 : index
    %c0_31 = arith.constant 0 : index
    %c7 = arith.constant 7 : index
    %c0_32 = arith.constant 0 : index
    %77 = vector.load %arg4[%c0_30, %c0_31, %c7, %c0_32] : memref<1x1x8x8xf32, #tpu.memory_space<vmem>>, vector<1x1x1x8xf32>
    %78 = vector.shape_cast %77 : vector<1x1x1x8xf32> to vector<1x8xf32>
    %79 = vector.shape_cast %76 : vector<1x8xf32> to vector<1x1x1x8xf32>
    tpu.vector_store %arg4[%c0_30, %c0_31, %c7, %c0_32], %79 {strides = array<i32>} : memref<1x1x8x8xf32, #tpu.memory_space<vmem>>, vector<1x1x1x8xf32>,
    return
  }
  func.func @transform_0(%arg0: i32, %arg1: i32) -> (i32, i32) {
    %c0_i32 = arith.constant 0 : i32
    %c0_i32_0 = arith.constant 0 : i32
    %c0_i32_1 = arith.constant 0 : i32
    return %c0_i32, %c0_i32_0 : i32, i32
  }
  func.func @transform_1(%arg0: i32, %arg1: i32) -> (i32, i32, i32, i32) {
    %c0_i32 = arith.constant 0 : i32
    %c0_i32_0 = arith.constant 0 : i32
    %c0_i32_1 = arith.constant 0 : i32
    return %arg0, %arg1, %c0_i32, %c0_i32_0 : i32, i32, i32, i32
  }
  func.func @transform_2(%arg0: i32, %arg1: i32) -> (i32, i32, i32, i32) {
    %c0_i32 = arith.constant 0 : i32
    %c0_i32_0 = arith.constant 0 : i32
    %c0_i32_1 = arith.constant 0 : i32
    return %arg0, %arg1, %c0_i32, %c0_i32_0 : i32, i32, i32, i32
  }
}

module attributes {stable_mosaic.version = 11 : i64} {
  func.func @_equi2cube_kernel(%arg0: i32, %arg1: i32, %arg2: memref<16x32xbf16, #tpu.memory_space<vmem>>, %arg3: memref<1x1x8x64xf32, #tpu.memory_space<vmem>>, %arg4: memref<1x1x8x8xf32, #tpu.memory_space<vmem>>) attributes {dimension_semantics = [#tpu.dimension_semantics<parallel>, #tpu.dimension_semantics<parallel>], iteration_bounds = array<i64: 6, 1>, scalar_prefetch = 0 : i64, scratch_operands = 0 : i64, tpu.core_type = #tpu.core_type<tc>, window_params = [{pipeline_mode = #tpu.pipeline_mode<synchronous>, transform_indices = @transform_0, window_bounds = array<i64: 16, 32>}, {transform_indices = @transform_1, window_bounds = array<i64: 1, 1, 8, 64>}, {transform_indices = @transform_2, window_bounds = array<i64: 1, 1, 8, 8>}]} {
    %c0 = arith.constant 0 : index
    %c0_0 = arith.constant 0 : index
    %c0_1 = arith.constant 0 : index
    %c0_2 = arith.constant 0 : index
    %0 = vector.load %arg3[%c0, %c0_0, %c0_1, %c0_2] : memref<1x1x8x64xf32, #tpu.memory_space<vmem>>, vector<1x1x8x64xf32>
    %1 = vector.shape_cast %0 : vector<1x1x8x64xf32> to vector<8x64xf32>
    %2 = vector.extract_strided_slice %1 {offsets = [0, 0], sizes = [1, 64], strides = [1, 1]} : vector<8x64xf32> to vector<1x64xf32>
    %3 = vector.extract_strided_slice %1 {offsets = [1, 0], sizes = [1, 64], strides = [1, 1]} : vector<8x64xf32> to vector<1x64xf32>
    %4 = tpu.concatenate %2, %3 in 1 : vector<1x64xf32>, vector<1x64xf32> -> vector<1x128xf32>
    %5 = arith.fptosi %4 : vector<1x128xf32> to vector<1x128xi32>
    %6 = vector.extract_strided_slice %1 {offsets = [2, 0], sizes = [1, 64], strides = [1, 1]} : vector<8x64xf32> to vector<1x64xf32>
    %7 = arith.fptosi %6 : vector<1x64xf32> to vector<1x64xi32>
    %8 = vector.extract_strided_slice %1 {offsets = [3, 0], sizes = [1, 64], strides = [1, 1]} : vector<8x64xf32> to vector<1x64xf32>
    %9 = arith.fptosi %8 : vector<1x64xf32> to vector<1x64xi32>
    %10 = vector.extract_strided_slice %1 {offsets = [4, 0], sizes = [1, 64], strides = [1, 1]} : vector<8x64xf32> to vector<1x64xf32>
    %11 = vector.extract_strided_slice %1 {offsets = [5, 0], sizes = [1, 64], strides = [1, 1]} : vector<8x64xf32> to vector<1x64xf32>
    %12 = vector.extract_strided_slice %1 {offsets = [6, 0], sizes = [1, 64], strides = [1, 1]} : vector<8x64xf32> to vector<1x64xf32>
    %13 = vector.extract_strided_slice %1 {offsets = [7, 0], sizes = [1, 64], strides = [1, 1]} : vector<8x64xf32> to vector<1x64xf32>
    %c0_3 = arith.constant 0 : index
    %c0_4 = arith.constant 0 : index
    %14 = vector.load %arg2[%c0_3, %c0_4] : memref<16x32xbf16, #tpu.memory_space<vmem>>, vector<16x32xbf16>
    %15 = tpu.iota {dimensions = array<i32: 0>} : vector<32x128xi32>
    %c0_i32 = arith.constant 0 : i32
    %16 = vector.broadcast %c0_i32 : i32 to vector<32x128xi32>
    %17 = arith.addi %15, %16 : vector<32x128xi32>
    %18 = vector.broadcast %5 : vector<1x128xi32> to vector<32x128xi32>
    %19 = arith.cmpi eq, %17, %18 : vector<32x128xi32>
    %20 = arith.extui %19 : vector<32x128xi1> to vector<32x128xi32>
    %21 = arith.sitofp %20 : vector<32x128xi32> to vector<32x128xf32>
    %22 = arith.truncf %21 : vector<32x128xf32> to vector<32x128xbf16>
    %cst = arith.constant dense<0.000000e+00> : vector<16x128xf32>
    %23 = tpu.matmul %14, %22, %cst {dimension_numbers = #tpu.dot_dimension_numbers<[1], [0], [0], [1], [0, 0, 1, 1], [], []>} : vector<16x32xbf16>, vector<32x128xbf16>, vector<16x128xf32> -> vector<16x128xf32>
    %24 = vector.extract_strided_slice %23 {offsets = [0, 0], sizes = [16, 64], strides = [1, 1]} : vector<16x128xf32> to vector<16x64xf32>
    %25 = vector.broadcast %10 : vector<1x64xf32> to vector<16x64xf32>
    %26 = arith.mulf %24, %25 : vector<16x64xf32>
    %27 = vector.extract_strided_slice %23 {offsets = [0, 64], sizes = [16, 64], strides = [1, 1]} : vector<16x128xf32> to vector<16x64xf32>
    %28 = vector.broadcast %11 : vector<1x64xf32> to vector<16x64xf32>
    %29 = arith.mulf %27, %28 : vector<16x64xf32>
    %30 = arith.addf %26, %29 : vector<16x64xf32>
    %31 = tpu.iota {dimensions = array<i32: 0>} : vector<16x64xi32>
    %32 = vector.broadcast %7 : vector<1x64xi32> to vector<16x64xi32>
    %33 = arith.cmpi eq, %31, %32 : vector<16x64xi32>
    %cst_5 = arith.constant 0.000000e+00 : f32
    %34 = vector.shape_cast %12 : vector<1x64xf32> to vector<1x64xf32>
    %35 = vector.broadcast %34 : vector<1x64xf32> to vector<16x64xf32>
    %36 = vector.broadcast %cst_5 : f32 to vector<16x64xf32>
    %37 = arith.select %33, %35, %36 : vector<16x64xi1>, vector<16x64xf32>
    %38 = vector.broadcast %9 : vector<1x64xi32> to vector<16x64xi32>
    %39 = arith.cmpi eq, %31, %38 : vector<16x64xi32>
    %cst_6 = arith.constant 0.000000e+00 : f32
    %40 = vector.shape_cast %13 : vector<1x64xf32> to vector<1x64xf32>
    %41 = vector.broadcast %40 : vector<1x64xf32> to vector<16x64xf32>
    %42 = vector.broadcast %cst_6 : f32 to vector<16x64xf32>
    %43 = arith.select %39, %41, %42 : vector<16x64xi1>, vector<16x64xf32>
    %44 = arith.addf %37, %43 : vector<16x64xf32>
    %45 = arith.mulf %44, %30 : vector<16x64xf32>
    %cst_7 = arith.constant dense<0.000000e+00> : vector<64xf32>
    %46 = vector.multi_reduction <add>, %45, %cst_7 [0] : vector<16x64xf32> to vector<64xf32>
    %47 = vector.shape_cast %46 : vector<64xf32> to vector<1x64xf32>
    %48 = vector.extract_strided_slice %47 {offsets = [0, 0], sizes = [1, 8], strides = [1, 1]} : vector<1x64xf32> to vector<1x8xf32>
    %c0_8 = arith.constant 0 : index
    %c0_9 = arith.constant 0 : index
    %c0_10 = arith.constant 0 : index
    %c0_11 = arith.constant 0 : index
    %49 = vector.load %arg4[%c0_8, %c0_9, %c0_10, %c0_11] : memref<1x1x8x8xf32, #tpu.memory_space<vmem>>, vector<1x1x1x8xf32>
    %50 = vector.shape_cast %49 : vector<1x1x1x8xf32> to vector<1x8xf32>
    %51 = vector.shape_cast %48 : vector<1x8xf32> to vector<1x1x1x8xf32>
    tpu.vector_store %arg4[%c0_8, %c0_9, %c0_10, %c0_11], %51 {strides = array<i32>} : memref<1x1x8x8xf32, #tpu.memory_space<vmem>>, vector<1x1x1x8xf32>,
    %52 = vector.extract_strided_slice %47 {offsets = [0, 8], sizes = [1, 8], strides = [1, 1]} : vector<1x64xf32> to vector<1x8xf32>
    %c0_12 = arith.constant 0 : index
    %c0_13 = arith.constant 0 : index
    %c1 = arith.constant 1 : index
    %c0_14 = arith.constant 0 : index
    %53 = vector.load %arg4[%c0_12, %c0_13, %c1, %c0_14] : memref<1x1x8x8xf32, #tpu.memory_space<vmem>>, vector<1x1x1x8xf32>
    %54 = vector.shape_cast %53 : vector<1x1x1x8xf32> to vector<1x8xf32>
    %55 = vector.shape_cast %52 : vector<1x8xf32> to vector<1x1x1x8xf32>
    tpu.vector_store %arg4[%c0_12, %c0_13, %c1, %c0_14], %55 {strides = array<i32>} : memref<1x1x8x8xf32, #tpu.memory_space<vmem>>, vector<1x1x1x8xf32>,
    %56 = vector.extract_strided_slice %47 {offsets = [0, 16], sizes = [1, 8], strides = [1, 1]} : vector<1x64xf32> to vector<1x8xf32>
    %c0_15 = arith.constant 0 : index
    %c0_16 = arith.constant 0 : index
    %c2 = arith.constant 2 : index
    %c0_17 = arith.constant 0 : index
    %57 = vector.load %arg4[%c0_15, %c0_16, %c2, %c0_17] : memref<1x1x8x8xf32, #tpu.memory_space<vmem>>, vector<1x1x1x8xf32>
    %58 = vector.shape_cast %57 : vector<1x1x1x8xf32> to vector<1x8xf32>
    %59 = vector.shape_cast %56 : vector<1x8xf32> to vector<1x1x1x8xf32>
    tpu.vector_store %arg4[%c0_15, %c0_16, %c2, %c0_17], %59 {strides = array<i32>} : memref<1x1x8x8xf32, #tpu.memory_space<vmem>>, vector<1x1x1x8xf32>,
    %60 = vector.extract_strided_slice %47 {offsets = [0, 24], sizes = [1, 8], strides = [1, 1]} : vector<1x64xf32> to vector<1x8xf32>
    %c0_18 = arith.constant 0 : index
    %c0_19 = arith.constant 0 : index
    %c3 = arith.constant 3 : index
    %c0_20 = arith.constant 0 : index
    %61 = vector.load %arg4[%c0_18, %c0_19, %c3, %c0_20] : memref<1x1x8x8xf32, #tpu.memory_space<vmem>>, vector<1x1x1x8xf32>
    %62 = vector.shape_cast %61 : vector<1x1x1x8xf32> to vector<1x8xf32>
    %63 = vector.shape_cast %60 : vector<1x8xf32> to vector<1x1x1x8xf32>
    tpu.vector_store %arg4[%c0_18, %c0_19, %c3, %c0_20], %63 {strides = array<i32>} : memref<1x1x8x8xf32, #tpu.memory_space<vmem>>, vector<1x1x1x8xf32>,
    %64 = vector.extract_strided_slice %47 {offsets = [0, 32], sizes = [1, 8], strides = [1, 1]} : vector<1x64xf32> to vector<1x8xf32>
    %c0_21 = arith.constant 0 : index
    %c0_22 = arith.constant 0 : index
    %c4 = arith.constant 4 : index
    %c0_23 = arith.constant 0 : index
    %65 = vector.load %arg4[%c0_21, %c0_22, %c4, %c0_23] : memref<1x1x8x8xf32, #tpu.memory_space<vmem>>, vector<1x1x1x8xf32>
    %66 = vector.shape_cast %65 : vector<1x1x1x8xf32> to vector<1x8xf32>
    %67 = vector.shape_cast %64 : vector<1x8xf32> to vector<1x1x1x8xf32>
    tpu.vector_store %arg4[%c0_21, %c0_22, %c4, %c0_23], %67 {strides = array<i32>} : memref<1x1x8x8xf32, #tpu.memory_space<vmem>>, vector<1x1x1x8xf32>,
    %68 = vector.extract_strided_slice %47 {offsets = [0, 40], sizes = [1, 8], strides = [1, 1]} : vector<1x64xf32> to vector<1x8xf32>
    %c0_24 = arith.constant 0 : index
    %c0_25 = arith.constant 0 : index
    %c5 = arith.constant 5 : index
    %c0_26 = arith.constant 0 : index
    %69 = vector.load %arg4[%c0_24, %c0_25, %c5, %c0_26] : memref<1x1x8x8xf32, #tpu.memory_space<vmem>>, vector<1x1x1x8xf32>
    %70 = vector.shape_cast %69 : vector<1x1x1x8xf32> to vector<1x8xf32>
    %71 = vector.shape_cast %68 : vector<1x8xf32> to vector<1x1x1x8xf32>
    tpu.vector_store %arg4[%c0_24, %c0_25, %c5, %c0_26], %71 {strides = array<i32>} : memref<1x1x8x8xf32, #tpu.memory_space<vmem>>, vector<1x1x1x8xf32>,
    %72 = vector.extract_strided_slice %47 {offsets = [0, 48], sizes = [1, 8], strides = [1, 1]} : vector<1x64xf32> to vector<1x8xf32>
    %c0_27 = arith.constant 0 : index
    %c0_28 = arith.constant 0 : index
    %c6 = arith.constant 6 : index
    %c0_29 = arith.constant 0 : index
    %73 = vector.load %arg4[%c0_27, %c0_28, %c6, %c0_29] : memref<1x1x8x8xf32, #tpu.memory_space<vmem>>, vector<1x1x1x8xf32>
    %74 = vector.shape_cast %73 : vector<1x1x1x8xf32> to vector<1x8xf32>
    %75 = vector.shape_cast %72 : vector<1x8xf32> to vector<1x1x1x8xf32>
    tpu.vector_store %arg4[%c0_27, %c0_28, %c6, %c0_29], %75 {strides = array<i32>} : memref<1x1x8x8xf32, #tpu.memory_space<vmem>>, vector<1x1x1x8xf32>,
    %76 = vector.extract_strided_slice %47 {offsets = [0, 56], sizes = [1, 8], strides = [1, 1]} : vector<1x64xf32> to vector<1x8xf32>
    %c0_30 = arith.constant 0 : index
    %c0_31 = arith.constant 0 : index
    %c7 = arith.constant 7 : index
    %c0_32 = arith.constant 0 : index
    %77 = vector.load %arg4[%c0_30, %c0_31, %c7, %c0_32] : memref<1x1x8x8xf32, #tpu.memory_space<vmem>>, vector<1x1x1x8xf32>
    %78 = vector.shape_cast %77 : vector<1x1x1x8xf32> to vector<1x8xf32>
    %79 = vector.shape_cast %76 : vector<1x8xf32> to vector<1x1x1x8xf32>
    tpu.vector_store %arg4[%c0_30, %c0_31, %c7, %c0_32], %79 {strides = array<i32>} : memref<1x1x8x8xf32, #tpu.memory_space<vmem>>, vector<1x1x1x8xf32>,
    return
  }
  func.func @transform_0(%arg0: i32, %arg1: i32) -> (i32, i32) {
    %c0_i32 = arith.constant 0 : i32
    %c0_i32_0 = arith.constant 0 : i32
    %c0_i32_1 = arith.constant 0 : i32
    return %c0_i32, %c0_i32_0 : i32, i32
  }
  func.func @transform_1(%arg0: i32, %arg1: i32) -> (i32, i32, i32, i32) {
    %c0_i32 = arith.constant 0 : i32
    %c0_i32_0 = arith.constant 0 : i32
    %c0_i32_1 = arith.constant 0 : i32
    return %arg0, %arg1, %c0_i32, %c0_i32_0 : i32, i32, i32, i32
  }
  func.func @transform_2(%arg0: i32, %arg1: i32) -> (i32, i32, i32, i32) {
    %c0_i32 = arith.constant 0 : i32
    %c0_i32_0 = arith.constant 0 : i32
    %c0_i32_1 = arith.constant 0 : i32
    return %arg0, %arg1, %c0_i32, %c0_i32_0 : i32, i32, i32, i32
  }
}

</mosaic_0001>

<bundles_post_ra>
// kernel: tpu_custom_call.1
= control target key start
LH: loop header
LB: loop body
LE: loop exit
PB: predicated region body
PF: predicated region fallthrough
CT: control target
= control target key end

     0   :  { %7 = vsyncpa [#allocation3], 0  ;;  %s905_s0 = inlined_call_operand.hbm [shape: bf16[16,32], index: 0, kind: input, shape index: {}]   ;;  %s906_s1 = inlined_call_operand.hbm [shape: f32[6,1,8,64], index: 1, kind: input, shape index: {}]   ;;  %s907_s2 = inlined_call_operand.hbm [shape: f32[6,1,8,8], index: 2, kind: output, shape index: {}]  }
   0x1   :  { %8 = vsyncpa [#allocation6], 0 }
   0x2   :  { %10 = vsyncpa [#allocation6 + $0x1], 0 }
   0x3   :  { %11 = vsyncpa [#allocation4], 0 }
   0x4   :  { %13 = vsyncpa [#allocation4 + $0x1], 0  ;;  %s734_s9 = smov 0   ;;  %s736_s10 = smov 0  }
   0x5   :  { %s738_s11 = smov 0   ;;  %s740_s12 = smov 0  }
   0x6   :  { %s742_s13 = smov 0   ;;  %s744_s14 = smov 0  }
   0x7 LB: > { %s436_s15 = sadd.s32 4294967295, %s705_s14   ;;  %p438_p0 = scmp.ge.s32.totalorder %s705_s14, 1  ;;  %s705_s14 = sphi %s744_s14, %s19_s14   ;;  %s701_s13 = sphi %s742_s13, %s918_s13   ;;  %s697_s12 = sphi %s740_s12, %s917_s12   ;;  %s693_s11 = sphi %s738_s11, %s916_s11   ;;  %s689_s10 = sphi %s736_s10, %s915_s10   ;;  %s685_s9 = sphi %s734_s9, %s914_s9  }
   0x8   : > { %p766_p1 = scmp.eq.s32.totalorder %s436_s15, 0  ;;  %p113_p2 = scmp.lt.s32.totalorder %s705_s14, 7 }
   0x9   : > { %s124_s19 = sshll.u32 %s905_s0, 4  ;;  %s707_s21 = smov [#allocation2]   ;;  %s125_s19 = int_to_ptr.hbm [resolvable:$true] %s124_s19 }
   0xa   : > { %p774_p3 = pnand %p438_p0, %p113_p2  ;;  %s126_s22 = sshll.u32 %s707_s21, 4  ;;  %s127_s22 = int_to_ptr.vmem [resolvable:$true] %s126_s22 }
   0xb   : > { %s708_s23 = smov 64   ;;  %s709_s24 = smov 4  }
   0xc   : > { %p483_p4 = pneg %p774_p3  ;;  %s437_s25 = sadd.s32 4294967294, %s705_s14  }
   0xd   : > { %s31_s26 = sadd.s32 1, %s701_s13  ;;  %s61_s27 = sadd.s32 1, %s693_s11 }
   0xe   : > { %p484_p5 = pnand %p483_p4, %p766_p1  ;;  %p33_p6 = scmp.ge.s32.totalorder %s31_s26, 6 }
   0xf   : > { %p68_p7 = scmp.ne.s32.totalorder %s693_s11, %s689_s10  ;;  %p69_p8 = scmp.eq.s32.totalorder %s705_s14, 0 }
  0x10   : > { %486 = dma.hbm_to_vmem [thread:$0]  (!%p484_p5), %s125_s19, 128, %s127_s22, [#allocation3], %s708_s23, %s708_s23, %s709_s24  }
  0x11   : > { %p74_p9 = scmp.ne.s32.totalorder %s689_s10, %s685_s9  ;;  %s920_s26 = smov (%p33_p6, %s31_s26), 0 }
  0x12   : > { %p792_p10 = por %p69_p8, %p68_p7  ;;  %s56_s30 = ssub.s32 %s701_s13, %s920_s26 }
  0x13   : > { %p798_p11 = por %p766_p1, %p74_p9  ;;  %p100_p12 = scmp.eq.s32.totalorder %s436_s15, 5 }
  0x14   : > { %p59_p13 = scmp.eq.s32.totalorder %s56_s30, 0  ;;  %p106_p0 = scmp.eq.s32.totalorder %s437_s25, 5 }
  0x15   : > { %p804_p2 = por %p100_p12, %p68_p7  ;;  %p496_p4 = scmp.lt.s32.totalorder %s705_s14, 6 }
  0x16   : > { %s810_s4 = scalar_select %p59_p13, %s693_s11, %s61_s27  }
  0x17   : > { %p812_p5 = por %p106_p0, %p74_p9  ;;  %s140_s6 = sand.u32 1, %s693_s11  }
  0x18   : > { %s441_s7 = sshll.u32 %s140_s6, 3  ;;  %s442_s8 = sshll.u32 %s701_s13, 3 }
  0x19   : > { %s149_s15 = scalar_lea.hbm %s906_s1, %s442_s8  ;;  %s144_s19 = scalar_lea.vmem [#allocation5], %s441_s7 }
  0x1a   : > { %s153_s21 = sshll.u32 %s144_s19, 4  ;;  %s151_s22 = sshll.u32 %s149_s15, 4  ;;  %s154_s21 = int_to_ptr.vmem [resolvable:$true] %s153_s21  ;;  %s152_s22 = int_to_ptr.hbm [resolvable:$true] %s151_s22 }
  0x1b   : > { %p488_p6 = pnand %p496_p4, %p792_p10  ;;  %s141_s23 = scalar_lea.sflag [#allocation6], %s140_s6 }
  0x1c   : > { %162 = sbr.rel (%p774_p3) target bundleno = 570 (0x23a), region = 28 }
  0x1d   : > { %490 = dma.hbm_to_vmem [thread:$0]  (!%p488_p6), %s152_s22, 128, %s154_s21, %s141_s23  }
  0x21   : > { %672 = dma.done.wait (%p766_p1), [#allocation3], 128  }
  0x22   : > { %674 = vsyncadd (%p766_p1), [#allocation3], 4294967168  ;;  %s830_s24 = sand.u32 1, %s689_s10  }
  0x23   : > { %s445_s25 = sshll.u32 %s830_s24, 3  ;;  %s170_s27 = scalar_lea.sflag [#allocation6], %s830_s24 }
  0x24   : > { %s173_s28 = scalar_lea.vmem [#allocation5], %s445_s25 }
  0x25   : > { %676 = dma.done.wait (%p798_p11), %s170_s27, 128  }
  0x26   : > { %678 = vsyncadd (%p798_p11), %s170_s27, 4294967168  ;;  %v196_v0 = vld [vmem:[%s173_s28] sm:$0xff]  ;;  %s710_s16 = smov 64   ;;  %v208_v3 = vlaneseq  ;;  %vm202_vm0 = vcmask 523264   ;;  %v711_v15 = vmov 1.0|1.0  }
  0x27   : > { %v198_v1 = vrot.slane %v196_v0, 1  ;;  %v254_v2 = vperm.slane %v196_v0, 5  ;;  %v464_v16 = vld [vmem:[#allocation2] sm:$0xff]  ;;  %vm233_vm8 = vcmask 261120   ;;  %v471_v22 = vceil.f32 %v196_v0  ;;  %s712_s20 = smov 96   ;;  %s713_s29 = smov 104  }
  0x28   : > { %v209_v6 = vshrl.u32 %v208_v3, 7  ;;  %v472_v23 = vfloor.f32 %v196_v0  ;;  %vm470_vm9 = vcmp.lt.s32.totalorder %v196_v0, 0  ;;  %v274_v28 = vperm.slane %v196_v0, 6  ;;  %s849_s30 = scalar_lea.vmem [#allocation7], %s445_s25  ;;  %s714_s6 = smov 120  }
  0x29   : > { %199 = vrot.lane.b32.xlu0 %v198_v1, %s710_s16  ;;  %v280_v29 = vperm.slane %v196_v0, 7  ;;  %v251_v30 = vperm.slane %v196_v0, 4  ;;  %vm296_vm14 = vcmask 57344   ;;  %s715_s7 = smov 72   ;;  %s716_s8 = smov 80  }
  0x2a   : > { %v211_v11 = vadd.s32 16, %v209_v6  ;;  %v212_v12 = vadd.s32 24, %v209_v6  ;;  %v210_v14 = vadd.s32 8, %v209_v6  ;;  %v473_v24 = vsel %vm470_vm9, %v471_v22, %v472_v23  ;;  %s717_s17 = smov 112   ;;  %s718_s18 = smov 88  }
  0x2b   : > { %v474_v25 = vcvt.f32.s32 %v473_v24  ;;  %s461_s15 = sshll.u32 %s697_s12, 3  ;;  %s341_s23 = sshll.u32 %s849_s30, 4  ;;  %s342_s23 = int_to_ptr.vmem [resolvable:$true] %s341_s23 }
  0x2c   : > { %s339_s22 = scalar_lea.hbm %s907_s2, %s461_s15  ;;  %s328_s12 = scalar_lea.sflag [#allocation4], %s830_s24 }
  0x2d   : > { %v271_v26 = vperm.slane %v474_v25, 2  ;;  %v277_v27 = vperm.slane %v474_v25, 3  ;;  %s343_s25 = sshll.u32 %s339_s22, 4  ;;  %s344_s25 = int_to_ptr.hbm [resolvable:$true] %s343_s25 }
  0x2e   : > { %s633_s27 = sshra.s32 %s344_s25, 4  ;;  %s634_s27 = int_to_ptr.hbm [resolvable:$true] %s633_s27 }
  0x2f   : > { %vm272_vm10 = vcmp.eq.s32.totalorder %v209_v6, %v271_v26  ;;  %vm278_vm11 = vcmp.eq.s32.totalorder %v209_v6, %v277_v27  ;;  %vm273_vm12 = vcmp.eq.s32.totalorder %v210_v14, %v271_v26  ;;  %vm279_vm13 = vcmp.eq.s32.totalorder %v210_v14, %v277_v27  ;;  %s635_s28 = scalar_lea.hbm %s634_s27, 8  ;;  %p640_p8 = scmp.lt.s32.totalorder %s634_s27, %s907_s2 }
  0x30   : > { %v275_v32 = vsel %vm272_vm10, %v274_v28, 0.0  ;;  %v281_v33 = vsel %vm278_vm11, %v280_v29, 0.0  ;;  %v276_v35 = vsel %vm273_vm12, %v274_v28, 0.0  ;;  %v282_v36 = vsel %vm279_vm13, %v280_v29, 0.0  ;;  %p636_p1 = scmp.ne.s32.totalorder %s634_s27, %s635_s28 }
  0x31   : > { %256 = vrot.lane.b32.xlu0 %v254_v2, %s710_s16  ;;  %v283_v37 = vadd.f32 %v281_v33, %v275_v32  ;;  %v284_v40 = vadd.f32 %v282_v36, %v276_v35 }
  0x32   : > { %p637_p3 = pnand %p636_p1, %p804_p2 }
  0x34   : > { %p638_p7 = pneg %p637_p3 }
  0x9b   : > { %v200_v4 = vpop.permute.xlu0 %199 }
  0x9c   : > { %v203_v5 = vsel %vm202_vm0, %v196_v0, %v200_v4 }
  0x9d   : > { %vm465_vm1 = vcmp.lt.s32.totalorder %v203_v5, 0  ;;  %v466_v7 = vceil.f32 %v203_v5  ;;  %v467_v8 = vfloor.f32 %v203_v5 }
  0x9f   : > { %v468_v9 = vsel %vm465_vm1, %v466_v7, %v467_v8 }
  0xa0   : > { %v469_v10 = vcvt.f32.s32 %v468_v9 }
  0xa2   : > { %v213_v13 = vperm.slane %v469_v10, 0 }
  0xa3   : > { %v257_v17 = vpop.permute.xlu0 %256 }
  0xa4   : > { %vm216_vm2 = vcmp.eq.s32.totalorder %v211_v11, %v213_v13  ;;  %vm217_vm3 = vcmp.eq.s32.totalorder %v212_v12, %v213_v13  ;;  %vm214_vm5 = vcmp.eq.s32.totalorder %v209_v6, %v213_v13  ;;  %vm215_vm6 = vcmp.eq.s32.totalorder %v210_v14, %v213_v13 }
  0xa5   : > { %vm455_vm4 = vmpackc.low %vm217_vm3, %vm216_vm2 }
  0xa6   : > { %456 = vmatpush.bf16.msk.msra.mxu0 %vm455_vm4, %v711_v15  ;;  %vm457_vm7 = vmpackc.low %vm215_vm6, %vm214_vm5 }
  0xaa   : > { %458 = vmatpush.bf16.msk.msra.mxu0 %vm457_vm7, %v711_v15 }
  0xad   : > { %459 = vmatmul.msk.bf16.vlgmr.msra.gmra.mxu0 %vm233_vm8, %v464_v16 }
 0x12a   : > { %v246_v18 = vpop.f32.mrf.mxu0 }
 0x12b   : > { %v259_v19 = vmul.f32 %v257_v17, %v246_v18  ;;  %v252_v34 = vmul.f32 %v251_v30, %v246_v18 }
 0x12d   : > { %263 = vrot.lane.b32.xlu1 %v259_v19, %s710_s16 }
 0x132   : > { %v248_v20 = vpop.f32.mrf.mxu0 }
 0x133   : > { %v260_v21 = vmul.f32 %v257_v17, %v248_v20  ;;  %v253_v39 = vmul.f32 %v251_v30, %v248_v20 }
 0x135   : > { %265 = vrot.lane.b32.xlu1 %v260_v21, %s710_s16 }
 0x19f   : > { %v264_v31 = vpop.permute.xlu1 %263 }
 0x1a0   : > { %v269_v38 = vadd.f32 %v264_v31, %v252_v34 }
 0x1a2   : > { %v285_v42 = vmul.f32 %v283_v37, %v269_v38 }
 0x1a4   : > { %v287_v45 = vsel %vm202_vm0, %v285_v42, 0.0 }
 0x1a7   : > { %v266_v41 = vpop.permute.xlu1 %265 }
 0x1a8   : > { %v270_v43 = vadd.f32 %v266_v41, %v253_v39 }
 0x1aa   : > { %v286_v44 = vmul.f32 %v284_v40, %v270_v43 }
 0x1ac   : > { %v288_v46 = vsel %vm202_vm0, %v286_v44, 0.0 }
 0x1ad   : > { %v289_v47 = vadd.f32 %v288_v46, %v287_v45 }
 0x1af   : > { %v290_v48 = vrot.slane %v289_v47, 4 }
 0x1b1   : > { %v291_v49 = vadd.f32 %v290_v48, %v289_v47 }
 0x1b3   : > { %v292_v50 = vrot.slane %v291_v49, 2 }
 0x1b5   : > { %v293_v51 = vadd.f32 %v292_v50, %v291_v49 }
 0x1b7   : > { %v294_v52 = vrot.slane %v293_v51, 1 }
 0x1b9   : > { %v295_v53 = vadd.f32 %v294_v52, %v293_v51 }
 0x1bb   : > { %311 = vrot.lane.b32.xlu1 %v295_v53, %s712_s20  ;;  %307 = vrot.lane.b32.xlu0 %v295_v53, %s713_s29  ;;  %297 = vst.msk [vmem:[%s849_s30] sm:$0x1] %vm296_vm14, %v295_v53  ;;  %s639_s29 = scalar_lea.hbm %s907_s2, 48 }
 0x1bc   : > { %299 = vrot.lane.b32.xlu2 %v295_v53, %s714_s6  ;;  %p641_p9 = scmp.lt.s32.totalorder %s639_s29, %s635_s28 }
 0x1be   : > { %p642_p10 = por %p641_p9, %p640_p8 }
 0x1c0   : > { %p643_p11 = pnand %p642_p10, %p638_p7 }
 0x1c3   : > { %323 = vrot.lane.b32.xlu1 %v295_v53, %s715_s7  ;;  %319 = vrot.lane.b32.xlu0 %v295_v53, %s716_s8 }
 0x1c4   : > { %303 = vrot.lane.b32.xlu2 %v295_v53, %s717_s17 }
 0x1cc   : > { %315 = vrot.lane.b32.xlu2 %v295_v53, %s718_s18 }
 0x216   : > { %v300_v54 = vpop.permute.xlu2 %299 }
 0x217   : > { %302 = vst.msk [vmem:[%s849_s30 + $0x1] sm:$0x1] %vm296_vm14, %v300_v54 }
 0x21e   : > { %v304_v55 = vpop.permute.xlu2 %303 }
 0x21f   : > { %306 = vst.msk [vmem:[%s849_s30 + $0x2] sm:$0x1] %vm296_vm14, %v304_v55 }
 0x226   : > { %v316_v56 = vpop.permute.xlu2 %315 }
 0x227   : > { %318 = vst.msk [vmem:[%s849_s30 + $0x5] sm:$0x1] %vm296_vm14, %v316_v56 }
 0x22d   : > { %v312_v57 = vpop.permute.xlu1 %311  ;;  %v308_v58 = vpop.permute.xlu0 %307 }
 0x22e   : > { %314 = vst.msk [vmem:[%s849_s30 + $0x4] sm:$0x1] %vm296_vm14, %v312_v57 }
 0x22f   : > { %310 = vst.msk [vmem:[%s849_s30 + $0x3] sm:$0x1] %vm296_vm14, %v308_v58 }
 0x235   : > { %v324_v59 = vpop.permute.xlu1 %323  ;;  %v320_v60 = vpop.permute.xlu0 %319 }
 0x236   : > { %326 = vst.msk [vmem:[%s849_s30 + $0x7] sm:$0x1] %vm296_vm14, %v324_v59 }
 0x237   : > { %322 = vst.msk [vmem:[%s849_s30 + $0x6] sm:$0x1] %vm296_vm14, %v320_v60 }
 0x238   : > { %646 = shalt.err (!%p643_p11)
}
 0x239   : > { %481 = dma.vmem_to_hbm [thread:$0]  (%p804_p2), %s342_s23, 128, %s344_s25, %s328_s12  }
 0x23a PF: > { %p498_p12 = scmp.ge.s32.totalorder %s705_s14, 2  ;;  %s355_s24 = sand.u32 1, %s685_s9  }
 0x23b   : > { %s356_s30 = scalar_lea.sflag [#allocation4], %s355_s24 }
 0x23c   : > { %p492_p13 = pnand %p498_p12, %p812_p5 }
 0x23e   : > { %p493_p0 = pneg %p492_p13 }
 0x240   : > { %680 = dma.done.wait (%p493_p0), %s356_s30, 128  }
 0x241   : > { %682 = vsyncadd (%p493_p0), %s356_s30, 4294967168  ;;  %s19_s14 = sadd.s32 1, %s705_s14   ;;  %s914_s9 = smov %s689_s10 }
 0x242   : > { %p16_p4 = scmp.ge.s32.totalorder %s19_s14, 8   ;;  %s915_s10 = smov %s693_s11 }
 0x243   : > { %s916_s11 = smov %s810_s4  ;;  %s917_s12 = smov %s701_s13 }
 0x244   : > { %s918_s13 = smov %s920_s26  ;;  %18 = sbr.rel (!%p16_p4) target bundleno = 7 (0x7), region = 78 }
 0x249   :  { %362 = vsyncpa [#allocation3], 1 }
 0x24a   :  { %364 = vsyncpa [#allocation3 + $0x1], 1 }
 0x24b   :  { %365 = vsyncpa [#allocation6], 1 }
 0x24c   :  { %367 = vsyncpa [#allocation6 + $0x1], 1 }
 0x24d   :  { %368 = vsyncpa [#allocation4], 1 }
 0x24e   :  { %370 = vsyncpa [#allocation4 + $0x1], 1 }

// kernel: tpu_custom_call.1
= control target key start
LH: loop header
LB: loop body
LE: loop exit
PB: predicated region body
PF: predicated region fallthrough
CT: control target
= control target key end

     0   :  { %7 = vsyncpa [#allocation3], 0  ;;  %s905_s0 = inlined_call_operand.hbm [shape: bf16[16,32], index: 0, kind: input, shape index: {}]   ;;  %s906_s1 = inlined_call_operand.hbm [shape: f32[6,1,8,64], index: 1, kind: input, shape index: {}]   ;;  %s907_s2 = inlined_call_operand.hbm [shape: f32[6,1,8,8], index: 2, kind: output, shape index: {}]  }
   0x1   :  { %8 = vsyncpa [#allocation6], 0 }
   0x2   :  { %10 = vsyncpa [#allocation6 + $0x1], 0 }
   0x3   :  { %11 = vsyncpa [#allocation4], 0 }
   0x4   :  { %13 = vsyncpa [#allocation4 + $0x1], 0  ;;  %s734_s9 = smov 0   ;;  %s736_s10 = smov 0  }
   0x5   :  { %s738_s11 = smov 0   ;;  %s740_s12 = smov 0  }
   0x6   :  { %s742_s13 = smov 0   ;;  %s744_s14 = smov 0  }
   0x7 LB: > { %s436_s15 = sadd.s32 4294967295, %s705_s14   ;;  %p438_p0 = scmp.ge.s32.totalorder %s705_s14, 1  ;;  %s705_s14 = sphi %s744_s14, %s19_s14   ;;  %s701_s13 = sphi %s742_s13, %s918_s13   ;;  %s697_s12 = sphi %s740_s12, %s917_s12   ;;  %s693_s11 = sphi %s738_s11, %s916_s11   ;;  %s689_s10 = sphi %s736_s10, %s915_s10   ;;  %s685_s9 = sphi %s734_s9, %s914_s9  }
   0x8   : > { %p766_p1 = scmp.eq.s32.totalorder %s436_s15, 0  ;;  %p113_p2 = scmp.lt.s32.totalorder %s705_s14, 7 }
   0x9   : > { %s124_s19 = sshll.u32 %s905_s0, 4  ;;  %s707_s21 = smov [#allocation2]   ;;  %s125_s19 = int_to_ptr.hbm [resolvable:$true] %s124_s19 }
   0xa   : > { %p774_p3 = pnand %p438_p0, %p113_p2  ;;  %s126_s22 = sshll.u32 %s707_s21, 4  ;;  %s127_s22 = int_to_ptr.vmem [resolvable:$true] %s126_s22 }
   0xb   : > { %s708_s23 = smov 64   ;;  %s709_s24 = smov 4  }
   0xc   : > { %p483_p4 = pneg %p774_p3  ;;  %s437_s25 = sadd.s32 4294967294, %s705_s14  }
   0xd   : > { %s31_s26 = sadd.s32 1, %s701_s13  ;;  %s61_s27 = sadd.s32 1, %s693_s11 }
   0xe   : > { %p484_p5 = pnand %p483_p4, %p766_p1  ;;  %p33_p6 = scmp.ge.s32.totalorder %s31_s26, 6 }
   0xf   : > { %p68_p7 = scmp.ne.s32.totalorder %s693_s11, %s689_s10  ;;  %p69_p8 = scmp.eq.s32.totalorder %s705_s14, 0 }
  0x10   : > { %486 = dma.hbm_to_vmem [thread:$0]  (!%p484_p5), %s125_s19, 128, %s127_s22, [#allocation3], %s708_s23, %s708_s23, %s709_s24  }
  0x11   : > { %p74_p9 = scmp.ne.s32.totalorder %s689_s10, %s685_s9  ;;  %s920_s26 = smov (%p33_p6, %s31_s26), 0 }
  0x12   : > { %p792_p10 = por %p69_p8, %p68_p7  ;;  %s56_s30 = ssub.s32 %s701_s13, %s920_s26 }
  0x13   : > { %p798_p11 = por %p766_p1, %p74_p9  ;;  %p100_p12 = scmp.eq.s32.totalorder %s436_s15, 5 }
  0x14   : > { %p59_p13 = scmp.eq.s32.totalorder %s56_s30, 0  ;;  %p106_p0 = scmp.eq.s32.totalorder %s437_s25, 5 }
  0x15   : > { %p804_p2 = por %p100_p12, %p68_p7  ;;  %p496_p4 = scmp.lt.s32.totalorder %s705_s14, 6 }
  0x16   : > { %s810_s4 = scalar_select %p59_p13, %s693_s11, %s61_s27  }
  0x17   : > { %p812_p5 = por %p106_p0, %p74_p9  ;;  %s140_s6 = sand.u32 1, %s693_s11  }
  0x18   : > { %s441_s7 = sshll.u32 %s140_s6, 3  ;;  %s442_s8 = sshll.u32 %s701_s13, 3 }
  0x19   : > { %s149_s15 = scalar_lea.hbm %s906_s1, %s442_s8  ;;  %s144_s19 = scalar_lea.vmem [#allocation5], %s441_s7 }
  0x1a   : > { %s153_s21 = sshll.u32 %s144_s19, 4  ;;  %s151_s22 = sshll.u32 %s149_s15, 4  ;;  %s154_s21 = int_to_ptr.vmem [resolvable:$true] %s153_s21  ;;  %s152_s22 = int_to_ptr.hbm [resolvable:$true] %s151_s22 }
  0x1b   : > { %p488_p6 = pnand %p496_p4, %p792_p10  ;;  %s141_s23 = scalar_lea.sflag [#allocation6], %s140_s6 }
  0x1c   : > { %162 = sbr.rel (%p774_p3) target bundleno = 570 (0x23a), region = 28 }
  0x1d   : > { %490 = dma.hbm_to_vmem [thread:$0]  (!%p488_p6), %s152_s22, 128, %s154_s21, %s141_s23  }
  0x21   : > { %672 = dma.done.wait (%p766_p1), [#allocation3], 128  }
  0x22   : > { %674 = vsyncadd (%p766_p1), [#allocation3], 4294967168  ;;  %s830_s24 = sand.u32 1, %s689_s10  }
  0x23   : > { %s445_s25 = sshll.u32 %s830_s24, 3  ;;  %s170_s27 = scalar_lea.sflag [#allocation6], %s830_s24 }
  0x24   : > { %s173_s28 = scalar_lea.vmem [#allocation5], %s445_s25 }
  0x25   : > { %676 = dma.done.wait (%p798_p11), %s170_s27, 128  }
  0x26   : > { %678 = vsyncadd (%p798_p11), %s170_s27, 4294967168  ;;  %v196_v0 = vld [vmem:[%s173_s28] sm:$0xff]  ;;  %s710_s16 = smov 64   ;;  %v208_v3 = vlaneseq  ;;  %vm202_vm0 = vcmask 523264   ;;  %v711_v15 = vmov 1.0|1.0  }
  0x27   : > { %v198_v1 = vrot.slane %v196_v0, 1  ;;  %v254_v2 = vperm.slane %v196_v0, 5  ;;  %v464_v16 = vld [vmem:[#allocation2] sm:$0xff]  ;;  %vm233_vm8 = vcmask 261120   ;;  %v471_v22 = vceil.f32 %v196_v0  ;;  %s712_s20 = smov 96   ;;  %s713_s29 = smov 104  }
  0x28   : > { %v209_v6 = vshrl.u32 %v208_v3, 7  ;;  %v472_v23 = vfloor.f32 %v196_v0  ;;  %vm470_vm9 = vcmp.lt.s32.totalorder %v196_v0, 0  ;;  %v274_v28 = vperm.slane %v196_v0, 6  ;;  %s849_s30 = scalar_lea.vmem [#allocation7], %s445_s25  ;;  %s714_s6 = smov 120  }
  0x29   : > { %199 = vrot.lane.b32.xlu0 %v198_v1, %s710_s16  ;;  %v280_v29 = vperm.slane %v196_v0, 7  ;;  %v251_v30 = vperm.slane %v196_v0, 4  ;;  %vm296_vm14 = vcmask 57344   ;;  %s715_s7 = smov 72   ;;  %s716_s8 = smov 80  }
  0x2a   : > { %v211_v11 = vadd.s32 16, %v209_v6  ;;  %v212_v12 = vadd.s32 24, %v209_v6  ;;  %v210_v14 = vadd.s32 8, %v209_v6  ;;  %v473_v24 = vsel %vm470_vm9, %v471_v22, %v472_v23  ;;  %s717_s17 = smov 112   ;;  %s718_s18 = smov 88  }
  0x2b   : > { %v474_v25 = vcvt.f32.s32 %v473_v24  ;;  %s461_s15 = sshll.u32 %s697_s12, 3  ;;  %s341_s23 = sshll.u32 %s849_s30, 4  ;;  %s342_s23 = int_to_ptr.vmem [resolvable:$true] %s341_s23 }
  0x2c   : > { %s339_s22 = scalar_lea.hbm %s907_s2, %s461_s15  ;;  %s328_s12 = scalar_lea.sflag [#allocation4], %s830_s24 }
  0x2d   : > { %v271_v26 = vperm.slane %v474_v25, 2  ;;  %v277_v27 = vperm.slane %v474_v25, 3  ;;  %s343_s25 = sshll.u32 %s339_s22, 4  ;;  %s344_s25 = int_to_ptr.hbm [resolvable:$true] %s343_s25 }
  0x2e   : > { %s633_s27 = sshra.s32 %s344_s25, 4  ;;  %s634_s27 = int_to_ptr.hbm [resolvable:$true] %s633_s27 }
  0x2f   : > { %vm272_vm10 = vcmp.eq.s32.totalorder %v209_v6, %v271_v26  ;;  %vm278_vm11 = vcmp.eq.s32.totalorder %v209_v6, %v277_v27  ;;  %vm273_vm12 = vcmp.eq.s32.totalorder %v210_v14, %v271_v26  ;;  %vm279_vm13 = vcmp.eq.s32.totalorder %v210_v14, %v277_v27  ;;  %s635_s28 = scalar_lea.hbm %s634_s27, 8  ;;  %p640_p8 = scmp.lt.s32.totalorder %s634_s27, %s907_s2 }
  0x30   : > { %v275_v32 = vsel %vm272_vm10, %v274_v28, 0.0  ;;  %v281_v33 = vsel %vm278_vm11, %v280_v29, 0.0  ;;  %v276_v35 = vsel %vm273_vm12, %v274_v28, 0.0  ;;  %v282_v36 = vsel %vm279_vm13, %v280_v29, 0.0  ;;  %p636_p1 = scmp.ne.s32.totalorder %s634_s27, %s635_s28 }
  0x31   : > { %256 = vrot.lane.b32.xlu0 %v254_v2, %s710_s16  ;;  %v283_v37 = vadd.f32 %v281_v33, %v275_v32  ;;  %v284_v40 = vadd.f32 %v282_v36, %v276_v35 }
  0x32   : > { %p637_p3 = pnand %p636_p1, %p804_p2 }
  0x34   : > { %p638_p7 = pneg %p637_p3 }
  0x9b   : > { %v200_v4 = vpop.permute.xlu0 %199 }
  0x9c   : > { %v203_v5 = vsel %vm202_vm0, %v196_v0, %v200_v4 }
  0x9d   : > { %vm465_vm1 = vcmp.lt.s32.totalorder %v203_v5, 0  ;;  %v466_v7 = vceil.f32 %v203_v5  ;;  %v467_v8 = vfloor.f32 %v203_v5 }
  0x9f   : > { %v468_v9 = vsel %vm465_vm1, %v466_v7, %v467_v8 }
  0xa0   : > { %v469_v10 = vcvt.f32.s32 %v468_v9 }
  0xa2   : > { %v213_v13 = vperm.slane %v469_v10, 0 }
  0xa3   : > { %v257_v17 = vpop.permute.xlu0 %256 }
  0xa4   : > { %vm216_vm2 = vcmp.eq.s32.totalorder %v211_v11, %v213_v13  ;;  %vm217_vm3 = vcmp.eq.s32.totalorder %v212_v12, %v213_v13  ;;  %vm214_vm5 = vcmp.eq.s32.totalorder %v209_v6, %v213_v13  ;;  %vm215_vm6 = vcmp.eq.s32.totalorder %v210_v14, %v213_v13 }
  0xa5   : > { %vm455_vm4 = vmpackc.low %vm217_vm3, %vm216_vm2 }
  0xa6   : > { %456 = vmatpush.bf16.msk.msra.mxu0 %vm455_vm4, %v711_v15  ;;  %vm457_vm7 = vmpackc.low %vm215_vm6, %vm214_vm5 }
  0xaa   : > { %458 = vmatpush.bf16.msk.msra.mxu0 %vm457_vm7, %v711_v15 }
  0xad   : > { %459 = vmatmul.msk.bf16.vlgmr.msra.gmra.mxu0 %vm233_vm8, %v464_v16 }
 0x12a   : > { %v246_v18 = vpop.f32.mrf.mxu0 }
 0x12b   : > { %v259_v19 = vmul.f32 %v257_v17, %v246_v18  ;;  %v252_v34 = vmul.f32 %v251_v30, %v246_v18 }
 0x12d   : > { %263 = vrot.lane.b32.xlu1 %v259_v19, %s710_s16 }
 0x132   : > { %v248_v20 = vpop.f32.mrf.mxu0 }
 0x133   : > { %v260_v21 = vmul.f32 %v257_v17, %v248_v20  ;;  %v253_v39 = vmul.f32 %v251_v30, %v248_v20 }
 0x135   : > { %265 = vrot.lane.b32.xlu1 %v260_v21, %s710_s16 }
 0x19f   : > { %v264_v31 = vpop.permute.xlu1 %263 }
 0x1a0   : > { %v269_v38 = vadd.f32 %v264_v31, %v252_v34 }
 0x1a2   : > { %v285_v42 = vmul.f32 %v283_v37, %v269_v38 }
 0x1a4   : > { %v287_v45 = vsel %vm202_vm0, %v285_v42, 0.0 }
 0x1a7   : > { %v266_v41 = vpop.permute.xlu1 %265 }
 0x1a8   : > { %v270_v43 = vadd.f32 %v266_v41, %v253_v39 }
 0x1aa   : > { %v286_v44 = vmul.f32 %v284_v40, %v270_v43 }
 0x1ac   : > { %v288_v46 = vsel %vm202_vm0, %v286_v44, 0.0 }
 0x1ad   : > { %v289_v47 = vadd.f32 %v288_v46, %v287_v45 }
 0x1af   : > { %v290_v48 = vrot.slane %v289_v47, 4 }
 0x1b1   : > { %v291_v49 = vadd.f32 %v290_v48, %v289_v47 }
 0x1b3   : > { %v292_v50 = vrot.slane %v291_v49, 2 }
 0x1b5   : > { %v293_v51 = vadd.f32 %v292_v50, %v291_v49 }
 0x1b7   : > { %v294_v52 = vrot.slane %v293_v51, 1 }
 0x1b9   : > { %v295_v53 = vadd.f32 %v294_v52, %v293_v51 }
 0x1bb   : > { %311 = vrot.lane.b32.xlu1 %v295_v53, %s712_s20  ;;  %307 = vrot.lane.b32.xlu0 %v295_v53, %s713_s29  ;;  %297 = vst.msk [vmem:[%s849_s30] sm:$0x1] %vm296_vm14, %v295_v53  ;;  %s639_s29 = scalar_lea.hbm %s907_s2, 48 }
 0x1bc   : > { %299 = vrot.lane.b32.xlu2 %v295_v53, %s714_s6  ;;  %p641_p9 = scmp.lt.s32.totalorder %s639_s29, %s635_s28 }
 0x1be   : > { %p642_p10 = por %p641_p9, %p640_p8 }
 0x1c0   : > { %p643_p11 = pnand %p642_p10, %p638_p7 }
 0x1c3   : > { %323 = vrot.lane.b32.xlu1 %v295_v53, %s715_s7  ;;  %319 = vrot.lane.b32.xlu0 %v295_v53, %s716_s8 }
 0x1c4   : > { %303 = vrot.lane.b32.xlu2 %v295_v53, %s717_s17 }
 0x1cc   : > { %315 = vrot.lane.b32.xlu2 %v295_v53, %s718_s18 }
 0x216   : > { %v300_v54 = vpop.permute.xlu2 %299 }
 0x217   : > { %302 = vst.msk [vmem:[%s849_s30 + $0x1] sm:$0x1] %vm296_vm14, %v300_v54 }
 0x21e   : > { %v304_v55 = vpop.permute.xlu2 %303 }
 0x21f   : > { %306 = vst.msk [vmem:[%s849_s30 + $0x2] sm:$0x1] %vm296_vm14, %v304_v55 }
 0x226   : > { %v316_v56 = vpop.permute.xlu2 %315 }
 0x227   : > { %318 = vst.msk [vmem:[%s849_s30 + $0x5] sm:$0x1] %vm296_vm14, %v316_v56 }
 0x22d   : > { %v312_v57 = vpop.permute.xlu1 %311  ;;  %v308_v58 = vpop.permute.xlu0 %307 }
 0x22e   : > { %314 = vst.msk [vmem:[%s849_s30 + $0x4] sm:$0x1] %vm296_vm14, %v312_v57 }
 0x22f   : > { %310 = vst.msk [vmem:[%s849_s30 + $0x3] sm:$0x1] %vm296_vm14, %v308_v58 }
 0x235   : > { %v324_v59 = vpop.permute.xlu1 %323  ;;  %v320_v60 = vpop.permute.xlu0 %319 }
 0x236   : > { %326 = vst.msk [vmem:[%s849_s30 + $0x7] sm:$0x1] %vm296_vm14, %v324_v59 }
 0x237   : > { %322 = vst.msk [vmem:[%s849_s30 + $0x6] sm:$0x1] %vm296_vm14, %v320_v60 }
 0x238   : > { %646 = shalt.err (!%p643_p11)
}
 0x239   : > { %481 = dma.vmem_to_hbm [thread:$0]  (%p804_p2), %s342_s23, 128, %s344_s25, %s328_s12  }
 0x23a PF: > { %p498_p12 = scmp.ge.s32.totalorder %s705_s14, 2  ;;  %s355_s24 = sand.u32 1, %s685_s9  }
 0x23b   : > { %s356_s30 = scalar_lea.sflag [#allocation4], %s355_s24 }
 0x23c   : > { %p492_p13 = pnand %p498_p12, %p812_p5 }
 0x23e   : > { %p493_p0 = pneg %p492_p13 }
 0x240   : > { %680 = dma.done.wait (%p493_p0), %s356_s30, 128  }
 0x241   : > { %682 = vsyncadd (%p493_p0), %s356_s30, 4294967168  ;;  %s19_s14 = sadd.s32 1, %s705_s14   ;;  %s914_s9 = smov %s689_s10 }
 0x242   : > { %p16_p4 = scmp.ge.s32.totalorder %s19_s14, 8   ;;  %s915_s10 = smov %s693_s11 }
 0x243   : > { %s916_s11 = smov %s810_s4  ;;  %s917_s12 = smov %s701_s13 }
 0x244   : > { %s918_s13 = smov %s920_s26  ;;  %18 = sbr.rel (!%p16_p4) target bundleno = 7 (0x7), region = 78 }
 0x249   :  { %362 = vsyncpa [#allocation3], 1 }
 0x24a   :  { %364 = vsyncpa [#allocation3 + $0x1], 1 }
 0x24b   :  { %365 = vsyncpa [#allocation6], 1 }
 0x24c   :  { %367 = vsyncpa [#allocation6 + $0x1], 1 }
 0x24d   :  { %368 = vsyncpa [#allocation4], 1 }
 0x24e   :  { %370 = vsyncpa [#allocation4 + $0x1], 1 }

</bundles_post_ra>
